<compile_context>
chip_gen: v7x
topology: tpu7x:2x2x1
jax: 0.10.0
libtpu: 0.0.40
codegen_flags: <defaults>
</compile_context>

<pallas_src>
import functools

import jax
import jax.numpy as jnp
from jax.experimental import pallas as pl
from jax.experimental.pallas import tpu as pltpu


def _patch_merging_kernel(x_ref, we_ref, wo_ref, b_ref, o_ref, *, inv_k, eps):
    # x_ref : (TR, 2, W2, 2C)  strip of TR merged rows (both source-row parities)
    # we_ref: (2C, 2C_out)     gamma-folded weight rows for the [x0|x2] half
    # wo_ref: (2C, 2C_out)     gamma-folded weight rows for the [x1|x3] half
    # b_ref : (1, 2C_out)      beta @ W^T  (f32)
    # o_ref : (TR*W2, 2C_out)
    tr, _, w2, k2 = x_ref.shape
    tm = tr * w2

    # Even / odd source rows -> token channel halves [x0|x2] / [x1|x3].
    # Cast to f32 *before* the leading-dim merge so the reshape sits on
    # 8-sublane f32 tiles (free when W2 % 8 == 0, as in the test shapes).
    xe = x_ref[:, 0, :, :].astype(jnp.float32).reshape(tm, k2)
    xo = x_ref[:, 1, :, :].astype(jnp.float32).reshape(tm, k2)

    # LayerNorm statistics over the full 4C channels (f32, biased variance).
    mean = (jnp.sum(xe, axis=-1, keepdims=True) +
            jnp.sum(xo, axis=-1, keepdims=True)) * inv_k
    ce = xe - mean
    co = xo - mean
    var = (jnp.sum(ce * ce, axis=-1, keepdims=True) +
           jnp.sum(co * co, axis=-1, keepdims=True)) * inv_k
    inv = jax.lax.rsqrt(var + eps)

    # LN affine + Linear are folded into we/wo/bias: just normalize, then MXU.
    ne = (ce * inv).astype(we_ref.dtype)
    no = (co * inv).astype(wo_ref.dtype)
    acc = jnp.dot(ne, we_ref[...], preferred_element_type=jnp.float32)
    acc = acc + jnp.dot(no, wo_ref[...], preferred_element_type=jnp.float32)
    acc = acc + b_ref[...]
    o_ref[...] = acc.astype(o_ref.dtype)


def _pick_row_tile(num_rows, w2, block_tokens):
    """Largest divisor TR of num_rows with TR*W2 <= block_tokens and a
    layout-legal output tile (TR*W2 multiple of 8, or the full extent)."""
    cands = [d for d in range(1, num_rows + 1)
             if num_rows % d == 0
             and d * w2 <= block_tokens
             and ((d * w2) % 8 == 0 or d == num_rows)]
    return max(cands) if cands else num_rows


def patch_merging_pallas(x, gamma, beta, weight, input_resolution, *,
                         block_tokens=1024, mxu_dtype=jnp.bfloat16):
    """x: (B, H*W, C); weight: (2C, 4C) torch-style. Returns (B, H/2*W/2, 2C)."""
    H, W = input_resolution
    B, L, C = x.shape
    assert L == H * W, "input feature has wrong size"
    assert H % 2 == 0 and W % 2 == 0, f"x size ({H}*{W}) are not even."

    R = B * (H // 2)     # merged rows
    W2 = W // 2          # merged cols (tokens per merged row)
    K2 = 2 * C           # channels per source-row half
    N = 2 * C            # output channels
    M = R * W2           # total merged tokens

    # ---- fused 2x2 gather: pure no-copy view -------------------------------
    # xr[r, p, w', :] covers x[b, 2*h'+p, 2*w':2*w'+2, :] with r = b*(H/2)+h'
    #   parity p=0 half -> [x0 | x2],   parity p=1 half -> [x1 | x3]
    xr = x.reshape(R, 2, W2, K2)

    # ---- fold LN affine + channel permutation into the weight (host side) --
    # torch channel order is [x0|x1|x2|x3]; our halves are [x0|x2] and [x1|x3].
    w_t = weight.astype(jnp.float32).T                          # (4C, 2C)
    g = gamma.astype(jnp.float32)
    idx_e = jnp.concatenate([jnp.arange(0, C), jnp.arange(2 * C, 3 * C)])
    idx_o = jnp.concatenate([jnp.arange(C, 2 * C), jnp.arange(3 * C, 4 * C)])
    w_e = (g[idx_e][:, None] * w_t[idx_e, :]).astype(mxu_dtype)  # (2C, 2C)
    w_o = (g[idx_o][:, None] * w_t[idx_o, :]).astype(mxu_dtype)  # (2C, 2C)
    bias = (beta.astype(jnp.float32) @ w_t).reshape(1, N)        # (1, 2C) f32

    # ---- tiling -------------------------------------------------------------
    tr = _pick_row_tile(R, W2, block_tokens)
    tm = tr * W2
    grid = (R // tr,)

    # VMEM budget: double-buffered in/out tiles + (double-buffered) constants
    # + f32 LN temporaries; capped with headroom under v7x's 64 MiB VMEM.
    in_bytes = tr * 2 * W2 * K2 * x.dtype.itemsize
    out_bytes = tm * N * x.dtype.itemsize
    const_bytes = 2 * K2 * N * jnp.dtype(mxu_dtype).itemsize + N * 4
    f32_tmp = 4 * tm * K2 * 4
    vmem_limit = int(min(56 * 2 ** 20,
                         max(32 * 2 ** 20,
                             2 * (2 * (in_bytes + out_bytes)
                                  + 2 * const_bytes + f32_tmp))))

    kernel = functools.partial(_patch_merging_kernel,
                               inv_k=1.0 / (4 * C), eps=1e-5)

    out2d = pl.pallas_call(
        kernel,
        out_shape=jax.ShapeDtypeStruct((M, N), x.dtype),
        grid_spec=pltpu.PrefetchScalarGridSpec(
            num_scalar_prefetch=0,
            grid=grid,
            in_specs=[
                pl.BlockSpec((tr, 2, W2, K2), lambda i: (i, 0, 0, 0)),  # x strip
                pl.BlockSpec((K2, N), lambda i: (0, 0)),                # w_e
                pl.BlockSpec((K2, N), lambda i: (0, 0)),                # w_o
                pl.BlockSpec((1, N), lambda i: (0, 0)),                 # bias
            ],
            out_specs=pl.BlockSpec((tm, N), lambda i: (i, 0)),
        ),
        compiler_params=pltpu.CompilerParams(
            dimension_semantics=("parallel",),
            vmem_limit_bytes=vmem_limit,
        ),
    )(xr, w_e, w_o, bias)

    return out2d.reshape(B, (H // 2) * W2, N)


def patch_merging_reference(x, gamma, beta, weight, input_resolution):
    """Pure-JAX f32 reference mirroring the PyTorch forward exactly."""
    H, W = input_resolution
    B, L, C = x.shape
    xg = x.reshape(B, H, W, C)
    x0 = xg[:, 0::2, 0::2, :]
    x1 = xg[:, 1::2, 0::2, :]
    x2 = xg[:, 0::2, 1::2, :]
    x3 = xg[:, 1::2, 1::2, :]
    m = jnp.concatenate([x0, x1, x2, x3], axis=-1).reshape(B, -1, 4 * C)
    m = m.astype(jnp.float32)
    mean = jnp.mean(m, axis=-1, keepdims=True)
    var = jnp.mean((m - mean) ** 2, axis=-1, keepdims=True)
    mn = (m - mean) / jnp.sqrt(var + 1e-5) * gamma + beta
    return (mn @ weight.T.astype(jnp.float32)).astype(x.dtype)


if __name__ == "__main__":
    key = jax.random.PRNGKey(0)
    B, H, W, C = 2, 16, 16, 32          # dim = 32 -> 4C = 128, 2C = 64
    k_x, k_w, k_g, k_b = jax.random.split(key, 4)

    x = jax.random.normal(k_x, (B, H * W, C), dtype=jnp.float32)
    # torch Linear weight shape: (2C, 4C), no bias
    weight = jax.random.normal(k_w, (2 * C, 4 * C), dtype=jnp.float32) * 0.02
    gamma = jnp.ones((4 * C,), dtype=jnp.float32) + 0.1 * jax.random.normal(
        k_g, (4 * C,), dtype=jnp.float32)
    beta = 0.1 * jax.random.normal(k_b, (4 * C,), dtype=jnp.float32)

    ref = patch_merging_reference(x, gamma, beta, weight, (H, W))

    # 1) exact path: f32 MXU operands, single block.
    out_f32 = jax.block_until_ready(
        patch_merging_pallas(x, gamma, beta, weight, (H, W),
                             mxu_dtype=jnp.float32))
    assert out_f32.shape == (B, (H // 2) * (W // 2), 2 * C), out_f32.shape
    assert jnp.allclose(out_f32, ref, atol=1e-4, rtol=1e-4), float(
        jnp.max(jnp.abs(out_f32 - ref)))

    # 2) exact path again with a multi-step grid (exercises the index_maps).
    out_multi = jax.block_until_ready(
        patch_merging_pallas(x, gamma, beta, weight, (H, W),
                             mxu_dtype=jnp.float32, block_tokens=32))
    assert jnp.allclose(out_multi, ref, atol=1e-4, rtol=1e-4), float(
        jnp.max(jnp.abs(out_multi - ref)))

    # 3) default perf path: bf16 MXU operands, f32 accumulation.
    out_bf16 = jax.block_until_ready(
        patch_merging_pallas(x, gamma, beta, weight, (H, W)))
    assert jnp.allclose(out_bf16, ref, atol=3e-2, rtol=3e-2), float(
        jnp.max(jnp.abs(out_bf16 - ref)))

    print("KERNEL_OK")
</pallas_src>

<mosaic_0001>
module attributes {stable_mosaic.version = 11 : i64} {
  func.func @_patch_merging_kernel(%arg0: i32, %arg1: memref<16x2x8x64xf32, #tpu.memory_space<vmem>>, %arg2: memref<64x64xf32, #tpu.memory_space<vmem>>, %arg3: memref<64x64xf32, #tpu.memory_space<vmem>>, %arg4: memref<1x64xf32, #tpu.memory_space<vmem>>, %arg5: memref<128x64xf32, #tpu.memory_space<vmem>>) attributes {dimension_semantics = [#tpu.dimension_semantics<parallel>], iteration_bounds = array<i64: 1>, scalar_prefetch = 0 : i64, scratch_operands = 0 : i64, tpu.core_type = #tpu.core_type<tc>, window_params = [{transform_indices = @transform_0, window_bounds = array<i64: 16, 2, 8, 64>}, {pipeline_mode = #tpu.pipeline_mode<synchronous>, transform_indices = @transform_1, window_bounds = array<i64: 64, 64>}, {pipeline_mode = #tpu.pipeline_mode<synchronous>, transform_indices = @transform_2, window_bounds = array<i64: 64, 64>}, {pipeline_mode = #tpu.pipeline_mode<synchronous>, transform_indices = @transform_3, window_bounds = array<i64: 1, 64>}, {transform_indices = @transform_4, window_bounds = array<i64: 128, 64>}]} {
    %c0 = arith.constant 0 : index
    %c0_0 = arith.constant 0 : index
    %c0_1 = arith.constant 0 : index
    %c0_2 = arith.constant 0 : index
    %0 = vector.load %arg1[%c0, %c0_0, %c0_1, %c0_2] : memref<16x2x8x64xf32, #tpu.memory_space<vmem>>, vector<16x1x8x64xf32>
    %1 = vector.shape_cast %0 : vector<16x1x8x64xf32> to vector<16x8x64xf32>
    %2 = vector.shape_cast %1 : vector<16x8x64xf32> to vector<128x64xf32>
    %c0_3 = arith.constant 0 : index
    %c1 = arith.constant 1 : index
    %c0_4 = arith.constant 0 : index
    %c0_5 = arith.constant 0 : index
    %3 = vector.load %arg1[%c0_3, %c1, %c0_4, %c0_5] : memref<16x2x8x64xf32, #tpu.memory_space<vmem>>, vector<16x1x8x64xf32>
    %4 = vector.shape_cast %3 : vector<16x1x8x64xf32> to vector<16x8x64xf32>
    %5 = vector.shape_cast %4 : vector<16x8x64xf32> to vector<128x64xf32>
    %cst = arith.constant dense<0.000000e+00> : vector<128xf32>
    %6 = vector.multi_reduction <add>, %2, %cst [1] : vector<128x64xf32> to vector<128xf32>
    %7 = vector.shape_cast %6 : vector<128xf32> to vector<128x1xf32>
    %cst_6 = arith.constant dense<0.000000e+00> : vector<128xf32>
    %8 = vector.multi_reduction <add>, %5, %cst_6 [1] : vector<128x64xf32> to vector<128xf32>
    %9 = vector.shape_cast %8 : vector<128xf32> to vector<128x1xf32>
    %10 = arith.addf %7, %9 : vector<128x1xf32>
    %cst_7 = arith.constant 7.812500e-03 : f32
    %11 = vector.broadcast %cst_7 : f32 to vector<128x1xf32>
    %12 = arith.mulf %10, %11 : vector<128x1xf32>
    %13 = vector.broadcast %12 : vector<128x1xf32> to vector<128x64xf32>
    %14 = arith.subf %2, %13 : vector<128x64xf32>
    %15 = vector.broadcast %12 : vector<128x1xf32> to vector<128x64xf32>
    %16 = arith.subf %5, %15 : vector<128x64xf32>
    %17 = arith.mulf %14, %14 : vector<128x64xf32>
    %cst_8 = arith.constant dense<0.000000e+00> : vector<128xf32>
    %18 = vector.multi_reduction <add>, %17, %cst_8 [1] : vector<128x64xf32> to vector<128xf32>
    %19 = vector.shape_cast %18 : vector<128xf32> to vector<128x1xf32>
    %20 = arith.mulf %16, %16 : vector<128x64xf32>
    %cst_9 = arith.constant dense<0.000000e+00> : vector<128xf32>
    %21 = vector.multi_reduction <add>, %20, %cst_9 [1] : vector<128x64xf32> to vector<128xf32>
    %22 = vector.shape_cast %21 : vector<128xf32> to vector<128x1xf32>
    %23 = arith.addf %19, %22 : vector<128x1xf32>
    %cst_10 = arith.constant 7.812500e-03 : f32
    %24 = vector.broadcast %cst_10 : f32 to vector<128x1xf32>
    %25 = arith.mulf %23, %24 : vector<128x1xf32>
    %cst_11 = arith.constant 9.99999974E-6 : f32
    %26 = vector.broadcast %cst_11 : f32 to vector<128x1xf32>
    %27 = arith.addf %25, %26 : vector<128x1xf32>
    %28 = math.rsqrt %27 : vector<128x1xf32>
    %29 = vector.broadcast %28 : vector<128x1xf32> to vector<128x64xf32>
    %30 = arith.mulf %14, %29 : vector<128x64xf32>
    %31 = vector.broadcast %28 : vector<128x1xf32> to vector<128x64xf32>
    %32 = arith.mulf %16, %31 : vector<128x64xf32>
    %c0_12 = arith.constant 0 : index
    %c0_13 = arith.constant 0 : index
    %33 = vector.load %arg2[%c0_12, %c0_13] : memref<64x64xf32, #tpu.memory_space<vmem>>, vector<64x64xf32>
    %cst_14 = arith.constant dense<0.000000e+00> : vector<128x64xf32>
    %34 = tpu.matmul %30, %33, %cst_14 {dimension_numbers = #tpu.dot_dimension_numbers<[1], [0], [0], [1], [0, 0, 1, 1], [], []>} : vector<128x64xf32>, vector<64x64xf32>, vector<128x64xf32> -> vector<128x64xf32>
    %c0_15 = arith.constant 0 : index
    %c0_16 = arith.constant 0 : index
    %35 = vector.load %arg3[%c0_15, %c0_16] : memref<64x64xf32, #tpu.memory_space<vmem>>, vector<64x64xf32>
    %cst_17 = arith.constant dense<0.000000e+00> : vector<128x64xf32>
    %36 = tpu.matmul %32, %35, %cst_17 {dimension_numbers = #tpu.dot_dimension_numbers<[1], [0], [0], [1], [0, 0, 1, 1], [], []>} : vector<128x64xf32>, vector<64x64xf32>, vector<128x64xf32> -> vector<128x64xf32>
    %37 = arith.addf %34, %36 : vector<128x64xf32>
    %c0_18 = arith.constant 0 : index
    %c0_19 = arith.constant 0 : index
    %38 = vector.load %arg4[%c0_18, %c0_19] : memref<1x64xf32, #tpu.memory_space<vmem>>, vector<1x64xf32>
    %39 = vector.broadcast %38 : vector<1x64xf32> to vector<128x64xf32>
    %40 = arith.addf %37, %39 : vector<128x64xf32>
    %c0_20 = arith.constant 0 : index
    %c0_21 = arith.constant 0 : index
    %41 = vector.load %arg5[%c0_20, %c0_21] : memref<128x64xf32, #tpu.memory_space<vmem>>, vector<128x64xf32>
    tpu.vector_store %arg5[%c0_20, %c0_21], %40 {strides = array<i32>} : memref<128x64xf32, #tpu.memory_space<vmem>>, vector<128x64xf32>,
    return
  }
  func.func @transform_0(%arg0: i32) -> (i32, i32, i32, i32) {
    %c0_i32 = arith.constant 0 : i32
    %c0_i32_0 = arith.constant 0 : i32
    %c0_i32_1 = arith.constant 0 : i32
    %c0_i32_2 = arith.constant 0 : i32
    return %arg0, %c0_i32, %c0_i32_0, %c0_i32_1 : i32, i32, i32, i32
  }
  func.func @transform_1(%arg0: i32) -> (i32, i32) {
    %c0_i32 = arith.constant 0 : i32
    %c0_i32_0 = arith.constant 0 : i32
    %c0_i32_1 = arith.constant 0 : i32
    return %c0_i32, %c0_i32_0 : i32, i32
  }
  func.func @transform_2(%arg0: i32) -> (i32, i32) {
    %c0_i32 = arith.constant 0 : i32
    %c0_i32_0 = arith.constant 0 : i32
    %c0_i32_1 = arith.constant 0 : i32
    return %c0_i32, %c0_i32_0 : i32, i32
  }
  func.func @transform_3(%arg0: i32) -> (i32, i32) {
    %c0_i32 = arith.constant 0 : i32
    %c0_i32_0 = arith.constant 0 : i32
    %c0_i32_1 = arith.constant 0 : i32
    return %c0_i32, %c0_i32_0 : i32, i32
  }
  func.func @transform_4(%arg0: i32) -> (i32, i32) {
    %c0_i32 = arith.constant 0 : i32
    %c0_i32_0 = arith.constant 0 : i32
    return %arg0, %c0_i32 : i32, i32
  }
}

</mosaic_0001>

<bundles_post_ra>
// kernel: tpu_custom_call.1
= control target key start
LH: loop header
LB: loop body
LE: loop exit
PB: predicated region body
PF: predicated region fallthrough
CT: control target
= control target key end

     0   :  { %9 = vsyncpa [#allocation3], 0  ;;  %s1790_s0 = inlined_call_operand.hbm [shape: f32[16,2,8,64], index: 0, kind: input, shape index: {}]   ;;  %s1791_s1 = inlined_call_operand.hbm [shape: f32[64,64], index: 1, kind: input, shape index: {}]   ;;  %s1792_s2 = inlined_call_operand.hbm [shape: f32[64,64], index: 2, kind: input, shape index: {}]   ;;  %s1793_s3 = inlined_call_operand.vmem [shape: f32[1,64], index: 3, kind: input, shape index: {}]   ;;  %s1794_s4 = inlined_call_operand.vmem [shape: f32[128,64], index: 4, kind: output, shape index: {}]  }
   0x1   :  { %10 = vsyncpa [#allocation5], 0  ;;  %s1239_s15 = smov [#allocation4]   ;;  %s1240_s17 = smov [#allocation2]  }
   0x2   :  { %s28_s16 = sshll.u32 %s1239_s15, 4  ;;  %s16_s18 = sshll.u32 %s1240_s17, 4  ;;  %s29_s16 = int_to_ptr.vmem [resolvable:$true] %s28_s16  ;;  %s1269_s18 = int_to_ptr.vmem [resolvable:$true] %s16_s18 }
   0x3   :  { %s1169_s21 = scalar_lea.hbm %s1791_s1, 1024 }
   0x4   :  { %p1170_p0 = scmp.ne.s32.totalorder %s1791_s1, %s1169_s21  ;;  %p1173_p1 = scmp.lt.u32.totalorder %s1169_s21, %s1791_s1 }
   0x6   :  { %p1175_p2 = pnand %p1173_p1, %p1170_p0 }
   0x8   :  { %1178 = shalt.err (!%p1175_p2)
}
   0x9   :  { %s1179_s26 = scalar_lea.vmem %s29_s16, 1024  ;;  %p1184_p4 = scmp.lt.s32.totalorder %s29_s16, %s29_s16 }
   0xa   :  { %p1180_p3 = scmp.ne.s32.totalorder %s29_s16, %s1179_s26  ;;  %p1185_p5 = scmp.lt.s32.totalorder %s1179_s26, %s1179_s26 }
   0xc   :  { %p1186_p6 = por %p1185_p5, %p1184_p4 }
   0xe   :  { %p1187_p7 = pnand %p1186_p6, %p1180_p3 }
  0x10   :  { %1190 = shalt.err (!%p1187_p7)
}
  0x11   :  { %s1241_s27 = smov 128   ;;  %s1242_s28 = smov 8  }
  0x12   :  { %34 = dma.hbm_to_vmem [thread:$0]  %s1791_s1, 1024, %s29_s16, [#allocation5], %s1241_s27, %s1241_s27, %s1242_s28  }
  0x13   :  { %s1191_s7 = scalar_lea.hbm %s1790_s0, 4096 }
  0x14   :  { %p1192_p8 = scmp.ne.s32.totalorder %s1790_s0, %s1191_s7  ;;  %p1195_p9 = scmp.lt.u32.totalorder %s1191_s7, %s1790_s0 }
  0x16   :  { %p1197_p10 = pnand %p1195_p9, %p1192_p8 }
  0x18   :  { %1200 = shalt.err (!%p1197_p10)
}
  0x19   :  { %s1201_s12 = scalar_lea.vmem %s1269_s18, 4096  ;;  %p1206_p12 = scmp.lt.s32.totalorder %s1269_s18, %s1269_s18 }
  0x1a   :  { %p1202_p11 = scmp.ne.s32.totalorder %s1269_s18, %s1201_s12  ;;  %p1207_p13 = scmp.lt.s32.totalorder %s1201_s12, %s1201_s12 }
  0x1c   :  { %p1208_p0 = por %p1207_p13, %p1206_p12 }
  0x1e   :  { %p1209_p1 = pnand %p1208_p0, %p1202_p11 }
  0x20   :  { %1212 = shalt.err (!%p1209_p1)
}
  0x21   :  { %22 = dma.hbm_to_vmem [thread:$0]  %s1790_s0, 4096, %s1269_s18, [#allocation3], %s1241_s27, %s1241_s27, %s1242_s28  }
  0x22   :  { %s1243_s14 = smov [#allocation6]   ;;  %s1213_s19 = scalar_lea.hbm %s1792_s2, 1024 }
  0x23   :  { %s40_s15 = sshll.u32 %s1243_s14, 4  ;;  %p1214_p2 = scmp.ne.s32.totalorder %s1792_s2, %s1213_s19  ;;  %s41_s15 = int_to_ptr.vmem [resolvable:$true] %s40_s15 }
  0x24   :  { %p1217_p3 = scmp.lt.u32.totalorder %s1213_s19, %s1792_s2 }
  0x26   :  { %p1219_p4 = pnand %p1217_p3, %p1214_p2 }
  0x28   :  { %1222 = shalt.err (!%p1219_p4)
}
  0x29   :  { %s1223_s24 = scalar_lea.vmem %s41_s15, 1024  ;;  %p1228_p6 = scmp.lt.s32.totalorder %s41_s15, %s41_s15 }
  0x2a   :  { %p1224_p5 = scmp.ne.s32.totalorder %s41_s15, %s1223_s24  ;;  %p1229_p7 = scmp.lt.s32.totalorder %s1223_s24, %s1223_s24 }
  0x2c   :  { %p1230_p8 = por %p1229_p7, %p1228_p6 }
  0x2e   :  { %p1231_p9 = pnand %p1230_p8, %p1224_p5 }
  0x30   :  { %1234 = shalt.err (!%p1231_p9)
}
  0x31   :  { %46 = dma.hbm_to_vmem [thread:$0]  %s1792_s2, 1024, %s41_s15, [#allocation5], %s1241_s27, %s1241_s27, %s1242_s28  }
  0x32   :  { %1235 = dma.done.wait [#allocation3], 4096  }
  0x33   :  { %1236 = vsyncadd [#allocation3], 4294963200 }
  0x34   :  { %1237 = dma.done.wait [#allocation5], 2048  }
  0x35   :  { %1238 = vsyncadd [#allocation5], 4294965248  ;;  %vm91_vm0 = vcmask 523264   ;;  %v1321_v0 = vld [vmem:[#allocation2 + $0x10] sm:$0xff]  ;;  %v1323_v1 = vld [vmem:[#allocation2] sm:$0xff] }
  0x36   :  { %v1325_v2 = vld [vmem:[#allocation2 + $0x18] sm:$0xff]  ;;  %v95_v3 = vsel %vm91_vm0, %v1321_v0, 0.0  ;;  %v92_v4 = vsel %vm91_vm0, %v1323_v1, 0.0  ;;  %v1331_v5 = vld [vmem:[#allocation2 + $0x8] sm:$0xff]  ;;  %v1339_v9 = vld [vmem:[#allocation2 + $0x20] sm:$0xff] }
  0x37   :  { %96 = vadd.xlane.f32.xlu1 %v95_v3  ;;  %93 = vadd.xlane.f32.xlu0 %v92_v4  ;;  %v143_v6 = vsel %vm91_vm0, %v1325_v2, 0.0  ;;  %v140_v7 = vsel %vm91_vm0, %v1331_v5, 0.0  ;;  %v1337_v8 = vld [vmem:[#allocation2 + $0x28] sm:$0xff]  ;;  %v98_v11 = vsel %vm91_vm0, %v1339_v9, 0.0  ;;  %v1345_v12 = vld [vmem:[#allocation2 + $0x38] sm:$0xff]  ;;  %v1347_v13 = vld [vmem:[#allocation2 + $0x30] sm:$0xff] }
  0x38   :  { %v146_v10 = vsel %vm91_vm0, %v1337_v8, 0.0  ;;  %v149_v14 = vsel %vm91_vm0, %v1345_v12, 0.0  ;;  %v101_v15 = vsel %vm91_vm0, %v1347_v13, 0.0  ;;  %v1353_v16 = vld [vmem:[#allocation2 + $0x48] sm:$0xff]  ;;  %v1355_v17 = vld [vmem:[#allocation2 + $0x40] sm:$0xff]  ;;  %v1361_v20 = vld [vmem:[#allocation2 + $0x58] sm:$0xff] }
  0x39   :  { %v152_v18 = vsel %vm91_vm0, %v1353_v16, 0.0  ;;  %v104_v19 = vsel %vm91_vm0, %v1355_v17, 0.0  ;;  %v1363_v21 = vld [vmem:[#allocation2 + $0x50] sm:$0xff]  ;;  %v155_v22 = vsel %vm91_vm0, %v1361_v20, 0.0  ;;  %v1369_v24 = vld [vmem:[#allocation2 + $0x68] sm:$0xff]  ;;  %v1371_v25 = vld [vmem:[#allocation2 + $0x60] sm:$0xff] }
  0x3a   :  { %v107_v23 = vsel %vm91_vm0, %v1363_v21, 0.0  ;;  %v158_v26 = vsel %vm91_vm0, %v1369_v24, 0.0  ;;  %v110_v27 = vsel %vm91_vm0, %v1371_v25, 0.0  ;;  %v1377_v28 = vld [vmem:[#allocation2 + $0x78] sm:$0xff]  ;;  %v1379_v29 = vld [vmem:[#allocation2 + $0x70] sm:$0xff]  ;;  %v1385_v32 = vld [vmem:[#allocation2 + $0x88] sm:$0xff] }
  0x3b   :  { %144 = vadd.xlane.f32.xlu1 %v143_v6  ;;  %141 = vadd.xlane.f32.xlu0 %v140_v7  ;;  %v161_v30 = vsel %vm91_vm0, %v1377_v28, 0.0  ;;  %v113_v31 = vsel %vm91_vm0, %v1379_v29, 0.0  ;;  %v1387_v33 = vld [vmem:[#allocation2 + $0x80] sm:$0xff]  ;;  %v164_v34 = vsel %vm91_vm0, %v1385_v32, 0.0  ;;  %v1393_v36 = vld [vmem:[#allocation2 + $0x98] sm:$0xff]  ;;  %v1395_v37 = vld [vmem:[#allocation2 + $0x90] sm:$0xff] }
  0x3c   :  { %v116_v35 = vsel %vm91_vm0, %v1387_v33, 0.0  ;;  %v167_v38 = vsel %vm91_vm0, %v1393_v36, 0.0  ;;  %v119_v39 = vsel %vm91_vm0, %v1395_v37, 0.0  ;;  %v1401_v40 = vld [vmem:[#allocation2 + $0xa8] sm:$0xff]  ;;  %v1403_v41 = vld [vmem:[#allocation2 + $0xa0] sm:$0xff]  ;;  %v1409_v44 = vld [vmem:[#allocation2 + $0xb8] sm:$0xff] }
  0x3d   :  { %v170_v42 = vsel %vm91_vm0, %v1401_v40, 0.0  ;;  %v122_v43 = vsel %vm91_vm0, %v1403_v41, 0.0  ;;  %v1411_v45 = vld [vmem:[#allocation2 + $0xb0] sm:$0xff]  ;;  %v173_v46 = vsel %vm91_vm0, %v1409_v44, 0.0  ;;  %v1417_v48 = vld [vmem:[#allocation2 + $0xc8] sm:$0xff]  ;;  %v1419_v49 = vld [vmem:[#allocation2 + $0xc0] sm:$0xff] }
  0x3e   :  { %v125_v47 = vsel %vm91_vm0, %v1411_v45, 0.0  ;;  %v176_v50 = vsel %vm91_vm0, %v1417_v48, 0.0  ;;  %v128_v51 = vsel %vm91_vm0, %v1419_v49, 0.0  ;;  %v1425_v52 = vld [vmem:[#allocation2 + $0xd8] sm:$0xff]  ;;  %v1427_v53 = vld [vmem:[#allocation2 + $0xd0] sm:$0xff]  ;;  %v1433_v56 = vld [vmem:[#allocation2 + $0xe8] sm:$0xff] }
  0x3f   :  { %147 = vadd.xlane.f32.xlu1 %v146_v10  ;;  %99 = vadd.xlane.f32.xlu0 %v98_v11  ;;  %v179_v54 = vsel %vm91_vm0, %v1425_v52, 0.0  ;;  %v131_v55 = vsel %vm91_vm0, %v1427_v53, 0.0  ;;  %v1435_v57 = vld [vmem:[#allocation2 + $0xe0] sm:$0xff]  ;;  %v182_v58 = vsel %vm91_vm0, %v1433_v56, 0.0  ;;  %v1441_v60 = vld [vmem:[#allocation2 + $0xf8] sm:$0xff]  ;;  %v1443_v61 = vld [vmem:[#allocation2 + $0xf0] sm:$0xff] }
  0x40   :  { %v134_v59 = vsel %vm91_vm0, %v1435_v57, 0.0  ;;  %v185_v62 = vsel %vm91_vm0, %v1441_v60, 0.0  ;;  %v137_v63 = vsel %vm91_vm0, %v1443_v61, 0.0 }
  0x43   :  { %150 = vadd.xlane.f32.xlu1 %v149_v14  ;;  %102 = vadd.xlane.f32.xlu0 %v101_v15 }
  0x47   :  { %153 = vadd.xlane.f32.xlu1 %v152_v18  ;;  %105 = vadd.xlane.f32.xlu0 %v104_v19 }
  0x4b   :  { %156 = vadd.xlane.f32.xlu1 %v155_v22  ;;  %108 = vadd.xlane.f32.xlu0 %v107_v23 }
  0x4f   :  { %159 = vadd.xlane.f32.xlu1 %v158_v26  ;;  %111 = vadd.xlane.f32.xlu0 %v110_v27 }
  0x53   :  { %162 = vadd.xlane.f32.xlu1 %v161_v30  ;;  %114 = vadd.xlane.f32.xlu0 %v113_v31 }
  0x57   :  { %165 = vadd.xlane.f32.xlu1 %v164_v34  ;;  %117 = vadd.xlane.f32.xlu0 %v116_v35 }
  0x5b   :  { %168 = vadd.xlane.f32.xlu1 %v167_v38  ;;  %120 = vadd.xlane.f32.xlu0 %v119_v39 }
  0x5f   :  { %171 = vadd.xlane.f32.xlu1 %v170_v42  ;;  %123 = vadd.xlane.f32.xlu0 %v122_v43 }
  0x63   :  { %174 = vadd.xlane.f32.xlu1 %v173_v46  ;;  %126 = vadd.xlane.f32.xlu0 %v125_v47 }
  0x67   :  { %177 = vadd.xlane.f32.xlu1 %v176_v50  ;;  %129 = vadd.xlane.f32.xlu0 %v128_v51 }
  0x6b   :  { %180 = vadd.xlane.f32.xlu1 %v179_v54  ;;  %132 = vadd.xlane.f32.xlu0 %v131_v55 }
  0x6f   :  { %183 = vadd.xlane.f32.xlu1 %v182_v58  ;;  %135 = vadd.xlane.f32.xlu0 %v134_v59 }
  0x73   :  { %186 = vadd.xlane.f32.xlu1 %v185_v62  ;;  %138 = vadd.xlane.f32.xlu0 %v137_v63 }
  0xc4   :  { %v97_v3 = vpop.xlane.xlu1 %96  ;;  %v94_v4 = vpop.xlane.xlu0 %93 }
  0xc8   :  { %v145_v6 = vpop.xlane.xlu1 %144  ;;  %v142_v7 = vpop.xlane.xlu0 %141 }
  0xc9   :  { %v189_v10 = vadd.f32 %v145_v6, %v97_v3  ;;  %v188_v11 = vadd.f32 %v142_v7, %v94_v4 }
  0xcb   :  { %v205_v14 = vmul.f32 0.0078125, %v189_v10  ;;  %v204_v15 = vmul.f32 0.0078125, %v188_v11 }
  0xcc   :  { %v148_v18 = vpop.xlane.xlu1 %147  ;;  %v100_v19 = vpop.xlane.xlu0 %99 }
  0xcd   :  { %v1450_v22 = vsub.f32 %v1321_v0, %v205_v14  ;;  %v1453_v23 = vsub.f32 %v1325_v2, %v205_v14  ;;  %v1456_v26 = vsub.f32 %v1323_v1, %v204_v15  ;;  %v1459_v27 = vsub.f32 %v1331_v5, %v204_v15 }
  0xce   :  { %v190_v30 = vadd.f32 %v148_v18, %v100_v19 }
  0xcf   :  { %v316_v31 = vmul.f32 %v1459_v27, %v1459_v27  ;;  %v252_v34 = vmul.f32 %v1456_v26, %v1456_v26  ;;  %v317_v2 = vmul.f32 %v1453_v23, %v1453_v23  ;;  %v253_v5 = vmul.f32 %v1450_v22, %v1450_v22 }
  0xd0   :  { %v206_v35 = vmul.f32 0.0078125, %v190_v30  ;;  %v151_v38 = vpop.xlane.xlu1 %150  ;;  %v103_v0 = vpop.xlane.xlu0 %102 }
  0xd1   :  { %v332_v39 = vsel %vm91_vm0, %v316_v31, 0.0  ;;  %v268_v1 = vsel %vm91_vm0, %v252_v34, 0.0  ;;  %v191_v42 = vadd.f32 %v151_v38, %v103_v0  ;;  %v335_v50 = vsel %vm91_vm0, %v317_v2, 0.0 }
  0xd2   :  { %v1472_v43 = vsub.f32 %v1339_v9, %v206_v35  ;;  %v1475_v46 = vsub.f32 %v1337_v8, %v206_v35  ;;  %333 = vadd.xlane.f32.xlu1 %v332_v39  ;;  %269 = vadd.xlane.f32.xlu0 %v268_v1  ;;  %v271_v8 = vsel %vm91_vm0, %v253_v5, 0.0 }
  0xd3   :  { %v207_v47 = vmul.f32 0.0078125, %v191_v42 }
  0xd4   :  { %v154_v51 = vpop.xlane.xlu1 %153  ;;  %v106_v54 = vpop.xlane.xlu0 %105  ;;  %v318_v55 = vmul.f32 %v1475_v46, %v1475_v46  ;;  %v254_v58 = vmul.f32 %v1472_v43, %v1472_v43 }
  0xd5   :  { %v1483_v59 = vsub.f32 %v1347_v13, %v207_v47  ;;  %v1486_v9 = vsub.f32 %v1345_v12, %v207_v47  ;;  %v192_v62 = vadd.f32 %v154_v51, %v106_v54 }
  0xd6   :  { %336 = vadd.xlane.f32.xlu1 %v335_v50  ;;  %272 = vadd.xlane.f32.xlu0 %v271_v8  ;;  %v338_v63 = vsel %vm91_vm0, %v318_v55, 0.0  ;;  %v274_v4 = vsel %vm91_vm0, %v254_v58, 0.0 }
  0xd7   :  { %v208_v3 = vmul.f32 0.0078125, %v192_v62  ;;  %v319_v6 = vmul.f32 %v1486_v9, %v1486_v9  ;;  %v255_v13 = vmul.f32 %v1483_v59, %v1483_v59 }
  0xd8   :  { %v157_v7 = vpop.xlane.xlu1 %156  ;;  %v109_v10 = vpop.xlane.xlu0 %108 }
  0xd9   :  { %v1496_v12 = vsub.f32 %v1355_v17, %v208_v3  ;;  %v1499_v11 = vsub.f32 %v1353_v16, %v208_v3  ;;  %v193_v14 = vadd.f32 %v157_v7, %v109_v10  ;;  %v341_v15 = vsel %vm91_vm0, %v319_v6, 0.0  ;;  %v485_v6 = vld [vmem:[#allocation6 + $0x8] sm:$0xff] }
  0xda   :  { %339 = vadd.xlane.f32.xlu1 %v338_v63  ;;  %275 = vadd.xlane.f32.xlu0 %v274_v4  ;;  %v277_v19 = vsel %vm91_vm0, %v255_v13, 0.0  ;;  %v484_v4 = vld [vmem:[#allocation6] sm:$0xff] }
  0xdb   :  { %v209_v18 = vmul.f32 0.0078125, %v193_v14  ;;  %v320_v30 = vmul.f32 %v1499_v11, %v1499_v11  ;;  %v256_v31 = vmul.f32 %v1496_v12, %v1496_v12  ;;  %v476_v13 = vld [vmem:[#allocation4] sm:$0xff]  ;;  %v1084_v14 = vpack.c.bf16 %v485_v6, %v484_v4 }
  0xdc   :  { %v160_v34 = vpop.xlane.xlu1 %159  ;;  %v112_v17 = vpop.xlane.xlu0 %111  ;;  %v480_v4 = vld [vmem:[#allocation4 + $0x20] sm:$0xff] }
  0xdd   :  { %v1508_v35 = vsub.f32 %v1363_v21, %v209_v18  ;;  %v1511_v16 = vsub.f32 %v1361_v20, %v209_v18  ;;  %v194_v38 = vadd.f32 %v160_v34, %v112_v17  ;;  %v344_v0 = vsel %vm91_vm0, %v320_v30, 0.0  ;;  %1085 = vmatprep.subr.bf16.mxu1 %v1084_v14 }
  0xde   :  { %342 = vadd.xlane.f32.xlu1 %v341_v15  ;;  %278 = vadd.xlane.f32.xlu0 %v277_v19  ;;  %v280_v39 = vsel %vm91_vm0, %v256_v31, 0.0  ;;  %v477_v15 = vld [vmem:[#allocation4 + $0x8] sm:$0xff] }
  0xdf   :  { %v210_v2 = vmul.f32 0.0078125, %v194_v38  ;;  %v321_v1 = vmul.f32 %v1511_v16, %v1511_v16  ;;  %v257_v42 = vmul.f32 %v1508_v35, %v1508_v35  ;;  %v1100_v19 = vpack.c.bf16 %v477_v15, %v476_v13  ;;  %1087 = vmatpush3.bf16.msra.mxu1 %v1084_v14 }
  0xe0   :  { %v163_v5 = vpop.xlane.xlu1 %162  ;;  %v115_v21 = vpop.xlane.xlu0 %114 }
  0xe1   :  { %v1520_v47 = vsub.f32 %v1371_v25, %v210_v2  ;;  %v1523_v20 = vsub.f32 %v1369_v24, %v210_v2  ;;  %v195_v50 = vadd.f32 %v163_v5, %v115_v21  ;;  %v347_v51 = vsel %vm91_vm0, %v321_v1, 0.0  ;;  %1101 = vmatprep.subr.bf16.mxu0 %v1100_v19  ;;  %v487_v2 = vld [vmem:[#allocation6 + $0x18] sm:$0xff] }
  0xe2   :  { %345 = vadd.xlane.f32.xlu1 %v344_v0  ;;  %281 = vadd.xlane.f32.xlu0 %v280_v39  ;;  %v283_v55 = vsel %vm91_vm0, %v257_v42, 0.0  ;;  %v486_v0 = vld [vmem:[#allocation6 + $0x10] sm:$0xff]  ;;  %v479_v21 = vld [vmem:[#allocation4 + $0x18] sm:$0xff] }
  0xe3   :  { %v211_v54 = vmul.f32 0.0078125, %v195_v50  ;;  %v322_v58 = vmul.f32 %v1523_v20, %v1523_v20  ;;  %v258_v8 = vmul.f32 %v1520_v47, %v1520_v47  ;;  %v478_v39 = vld [vmem:[#allocation4 + $0x10] sm:$0xff]  ;;  %v1088_v5 = vpack.c.bf16 %v487_v2, %v486_v0  ;;  %1103 = vmatpush3.bf16.msra.mxu0 %v1100_v19 }
  0xe4   :  { %v166_v62 = vpop.xlane.xlu1 %165  ;;  %v118_v25 = vpop.xlane.xlu0 %117  ;;  %v482_v0 = vld [vmem:[#allocation4 + $0x30] sm:$0xff] }
  0xe5   :  { %v1532_v63 = vsub.f32 %v1379_v29, %v211_v54  ;;  %v1535_v24 = vsub.f32 %v1377_v28, %v211_v54  ;;  %v196_v3 = vadd.f32 %v166_v62, %v118_v25  ;;  %v350_v7 = vsel %vm91_vm0, %v322_v58, 0.0  ;;  %1089 = vmatprep.subr.bf16.mxu1 %v1088_v5  ;;  %v488_v25 = vld [vmem:[#allocation6 + $0x20] sm:$0xff] }
  0xe6   :  { %348 = vadd.xlane.f32.xlu1 %v347_v51  ;;  %284 = vadd.xlane.f32.xlu0 %v283_v55  ;;  %v286_v10 = vsel %vm91_vm0, %v258_v8, 0.0  ;;  %v1104_v51 = vpack.c.bf16 %v479_v21, %v478_v39 }
  0xe7   :  { %v212_v18 = vmul.f32 0.0078125, %v196_v3  ;;  %v323_v29 = vmul.f32 %v1535_v24, %v1535_v24  ;;  %v259_v28 = vmul.f32 %v1532_v63, %v1532_v63  ;;  %1091 = vmatpush3.bf16.msra.mxu1 %v1088_v5  ;;  %v489_v3 = vld [vmem:[#allocation6 + $0x28] sm:$0xff] }
  0xe8   :  { %v169_v30 = vpop.xlane.xlu1 %168  ;;  %v121_v31 = vpop.xlane.xlu0 %120  ;;  %1105 = vmatprep.subr.bf16.mxu0 %v1104_v51 }
  0xe9   :  { %v1544_v34 = vsub.f32 %v1387_v33, %v212_v18  ;;  %v1547_v17 = vsub.f32 %v1385_v32, %v212_v18  ;;  %v197_v38 = vadd.f32 %v169_v30, %v121_v31  ;;  %v353_v1 = vsel %vm91_vm0, %v323_v29, 0.0  ;;  %1107 = vmatpush3.bf16.msra.mxu0 %v1104_v51  ;;  %v490_v31 = vld [vmem:[#allocation6 + $0x30] sm:$0xff] }
  0xea   :  { %351 = vadd.xlane.f32.xlu1 %v350_v7  ;;  %287 = vadd.xlane.f32.xlu0 %v286_v10  ;;  %v289_v42 = vsel %vm91_vm0, %v259_v28, 0.0  ;;  %v1092_v7 = vpack.c.bf16 %v489_v3, %v488_v25  ;;  %v481_v10 = vld [vmem:[#allocation4 + $0x28] sm:$0xff] }
  0xeb   :  { %v213_v50 = vmul.f32 0.0078125, %v197_v38  ;;  %v324_v33 = vmul.f32 %v1547_v17, %v1547_v17  ;;  %v260_v32 = vmul.f32 %v1544_v34, %v1544_v34  ;;  %v1108_v15 = vpack.c.bf16 %v481_v10, %v480_v4  ;;  %v491_v38 = vld [vmem:[#allocation6 + $0x38] sm:$0xff] }
  0xec   :  { %v172_v54 = vpop.xlane.xlu1 %171  ;;  %v124_v55 = vpop.xlane.xlu0 %123  ;;  %1093 = vmatprep.subr.bf16.mxu1 %v1092_v7 }
  0xed   :  { %v1556_v58 = vsub.f32 %v1395_v37, %v213_v50  ;;  %v1559_v8 = vsub.f32 %v1393_v36, %v213_v50  ;;  %v198_v62 = vadd.f32 %v172_v54, %v124_v55  ;;  %v356_v6 = vsel %vm91_vm0, %v324_v33, 0.0  ;;  %1109 = vmatprep.subr.bf16.mxu0 %v1108_v15  ;;  %1095 = vmatpush3.bf16.msra.mxu1 %v1092_v7 }
  0xee   :  { %354 = vadd.xlane.f32.xlu1 %v353_v1  ;;  %290 = vadd.xlane.f32.xlu0 %v289_v42  ;;  %v292_v13 = vsel %vm91_vm0, %v260_v32, 0.0  ;;  %v1096_v1 = vpack.c.bf16 %v491_v38, %v490_v31  ;;  %v483_v42 = vld [vmem:[#allocation4 + $0x38] sm:$0xff] }
  0xef   :  { %v214_v14 = vmul.f32 0.0078125, %v198_v62  ;;  %v325_v37 = vmul.f32 %v1559_v8, %v1559_v8  ;;  %v261_v36 = vmul.f32 %v1556_v58, %v1556_v58  ;;  %1111 = vmatpush3.bf16.msra.mxu0 %v1108_v15  ;;  %v1112_v21 = vpack.c.bf16 %v483_v42, %v482_v0 }
  0xf0   :  { %v175_v18 = vpop.xlane.xlu1 %174  ;;  %v127_v29 = vpop.xlane.xlu0 %126  ;;  %1097 = vmatprep.subr.bf16.mxu1 %v1096_v1 }
  0xf1   :  { %v1568_v28 = vsub.f32 %v1403_v41, %v214_v14  ;;  %v1571_v19 = vsub.f32 %v1401_v40, %v214_v14  ;;  %v199_v30 = vadd.f32 %v175_v18, %v127_v29  ;;  %v359_v2 = vsel %vm91_vm0, %v325_v37, 0.0  ;;  %1113 = vmatprep.subr.bf16.mxu0 %v1112_v21  ;;  %1099 = vmatpush3.bf16.msra.mxu1 %v1096_v1 }
  0xf2   :  { %357 = vadd.xlane.f32.xlu1 %v356_v6  ;;  %293 = vadd.xlane.f32.xlu0 %v292_v13  ;;  %v295_v39 = vsel %vm91_vm0, %v261_v36, 0.0 }
  0xf3   :  { %v215_v5 = vmul.f32 0.0078125, %v199_v30  ;;  %v326_v41 = vmul.f32 %v1571_v19, %v1571_v19  ;;  %v262_v40 = vmul.f32 %v1568_v28, %v1568_v28  ;;  %1115 = vmatpush3.bf16.msra.mxu0 %v1112_v21 }
  0xf4   :  { %v178_v50 = vpop.xlane.xlu1 %177  ;;  %v130_v33 = vpop.xlane.xlu0 %129 }
  0xf5   :  { %v1580_v32 = vsub.f32 %v1411_v45, %v215_v5  ;;  %v1583_v51 = vsub.f32 %v1409_v44, %v215_v5  ;;  %v200_v54 = vadd.f32 %v178_v50, %v130_v33  ;;  %v362_v55 = vsel %vm91_vm0, %v326_v41, 0.0 }
  0xf6   :  { %360 = vadd.xlane.f32.xlu1 %v359_v2  ;;  %296 = vadd.xlane.f32.xlu0 %v295_v39  ;;  %v298_v25 = vsel %vm91_vm0, %v262_v40, 0.0 }
  0xf7   :  { %v216_v62 = vmul.f32 0.0078125, %v200_v54  ;;  %v327_v3 = vmul.f32 %v1583_v51, %v1583_v51  ;;  %v263_v45 = vmul.f32 %v1580_v32, %v1580_v32 }
  0xf8   :  { %v181_v4 = vpop.xlane.xlu1 %180  ;;  %v133_v44 = vpop.xlane.xlu0 %132 }
  0xf9   :  { %v1592_v6 = vsub.f32 %v1419_v49, %v216_v62  ;;  %v1595_v13 = vsub.f32 %v1417_v48, %v216_v62  ;;  %v201_v7 = vadd.f32 %v181_v4, %v133_v44  ;;  %v365_v10 = vsel %vm91_vm0, %v327_v3, 0.0 }
  0xfa   :  { %363 = vadd.xlane.f32.xlu1 %v362_v55  ;;  %299 = vadd.xlane.f32.xlu0 %v298_v25  ;;  %v301_v37 = vsel %vm91_vm0, %v263_v45, 0.0 }
  0xfb   :  { %v217_v14 = vmul.f32 0.0078125, %v201_v7  ;;  %v328_v36 = vmul.f32 %v1595_v13, %v1595_v13  ;;  %v264_v15 = vmul.f32 %v1592_v6, %v1592_v6 }
  0xfc   :  { %v184_v18 = vpop.xlane.xlu1 %183  ;;  %v136_v49 = vpop.xlane.xlu0 %135 }
  0xfd   :  { %v1604_v29 = vsub.f32 %v1427_v53, %v217_v14  ;;  %v1607_v48 = vsub.f32 %v1425_v52, %v217_v14  ;;  %v202_v30 = vadd.f32 %v184_v18, %v136_v49  ;;  %v368_v31 = vsel %vm91_vm0, %v328_v36, 0.0 }
  0xfe   :  { %366 = vadd.xlane.f32.xlu1 %v365_v10  ;;  %302 = vadd.xlane.f32.xlu0 %v301_v37  ;;  %v304_v0 = vsel %vm91_vm0, %v264_v15, 0.0 }
  0xff   :  { %v218_v38 = vmul.f32 0.0078125, %v202_v30  ;;  %v329_v2 = vmul.f32 %v1607_v48, %v1607_v48  ;;  %v265_v39 = vmul.f32 %v1604_v29, %v1604_v29 }
 0x100   :  { %v187_v1 = vpop.xlane.xlu1 %186  ;;  %v139_v53 = vpop.xlane.xlu0 %138 }
 0x101   :  { %v1616_v42 = vsub.f32 %v1435_v57, %v218_v38  ;;  %v1619_v52 = vsub.f32 %v1433_v56, %v218_v38  ;;  %v203_v5 = vadd.f32 %v187_v1, %v139_v53  ;;  %v371_v41 = vsel %vm91_vm0, %v329_v2, 0.0 }
 0x102   :  { %369 = vadd.xlane.f32.xlu1 %v368_v31  ;;  %305 = vadd.xlane.f32.xlu0 %v304_v0  ;;  %v307_v21 = vsel %vm91_vm0, %v265_v39, 0.0 }
 0x103   :  { %v219_v40 = vmul.f32 0.0078125, %v203_v5  ;;  %v330_v50 = vmul.f32 %v1619_v52, %v1619_v52  ;;  %v266_v33 = vmul.f32 %v1616_v42, %v1616_v42 }
 0x105   :  { %v1628_v57 = vsub.f32 %v1443_v61, %v219_v40  ;;  %v1631_v56 = vsub.f32 %v1441_v60, %v219_v40  ;;  %v374_v54 = vsel %vm91_vm0, %v330_v50, 0.0  ;;  %v310_v55 = vsel %vm91_vm0, %v266_v33, 0.0 }
 0x106   :  { %372 = vadd.xlane.f32.xlu1 %v371_v41  ;;  %308 = vadd.xlane.f32.xlu0 %v307_v21 }
 0x107   :  { %v331_v62 = vmul.f32 %v1631_v56, %v1631_v56  ;;  %v267_v25 = vmul.f32 %v1628_v57, %v1628_v57 }
 0x109   :  { %v377_v61 = vsel %vm91_vm0, %v331_v62, 0.0  ;;  %v313_v3 = vsel %vm91_vm0, %v267_v25, 0.0 }
 0x10a   :  { %375 = vadd.xlane.f32.xlu1 %v374_v54  ;;  %311 = vadd.xlane.f32.xlu0 %v310_v55 }
 0x10e   :  { %378 = vadd.xlane.f32.xlu1 %v377_v61  ;;  %314 = vadd.xlane.f32.xlu0 %v313_v3 }
 0x15f   :  { %v334_v60 = vpop.xlane.xlu1 %333  ;;  %v270_v45 = vpop.xlane.xlu0 %269 }
 0x160   :  { %v380_v4 = vadd.f32 %v334_v60, %v270_v45 }
 0x162   :  { %v396_v44 = vmul.f32 0.0078125, %v380_v4 }
 0x163   :  { %v337_v7 = vpop.xlane.xlu1 %336  ;;  %v273_v10 = vpop.xlane.xlu0 %272 }
 0x164   :  { %v412_v14 = vadd.f32 1e-05, %v396_v44  ;;  %v381_v37 = vadd.f32 %v337_v7, %v273_v10 }
 0x166   :  { %1137 = vrsqrt.f32 %v412_v14  ;;  %v397_v36 = vmul.f32 0.0078125, %v381_v37 }
 0x167   :  { %v340_v15 = vpop.xlane.xlu1 %339  ;;  %v276_v18 = vpop.xlane.xlu0 %275 }
 0x168   :  { %v413_v49 = vadd.f32 1e-05, %v397_v36  ;;  %v382_v30 = vadd.f32 %v340_v15, %v276_v18 }
 0x16a   :  { %1139 = vrsqrt.f32 %v413_v49  ;;  %v398_v31 = vmul.f32 0.0078125, %v382_v30 }
 0x16b   :  { %v343_v38 = vpop.xlane.xlu1 %342  ;;  %v279_v0 = vpop.xlane.xlu0 %278 }
 0x16c   :  { %v414_v2 = vadd.f32 1e-05, %v398_v31  ;;  %v383_v39 = vadd.f32 %v343_v38, %v279_v0 }
 0x16e   :  { %1141 = vrsqrt.f32 %v414_v2  ;;  %v399_v1 = vmul.f32 0.0078125, %v383_v39 }
 0x16f   :  { %v346_v53 = vpop.xlane.xlu1 %345  ;;  %v282_v5 = vpop.xlane.xlu0 %281 }
 0x170   :  { %v1138_v41 = vpop.eup %1137  ;;  %v415_v40 = vadd.f32 1e-05, %v399_v1  ;;  %v384_v21 = vadd.f32 %v346_v53, %v282_v5 }
 0x171   :  { %v460_v50 = vmul.f32 %v1138_v41, %v1459_v27  ;;  %v444_v33 = vmul.f32 %v1138_v41, %v1456_v26 }
 0x172   :  { %1143 = vrsqrt.f32 %v415_v40  ;;  %v400_v54 = vmul.f32 0.0078125, %v384_v21 }
 0x173   :  { %v349_v55 = vpop.xlane.xlu1 %348  ;;  %1020 = vmatprep.mubr.msk.f32.mxu1 %vm91_vm0, %v460_v50  ;;  %1060 = vmatprep.mubr.msk.f32.mxu0 %vm91_vm0, %v444_v33  ;;  %v285_v62 = vpop.xlane.xlu0 %284 }
 0x174   :  { %v1140_v25 = vpop.eup %1139  ;;  %v416_v61 = vadd.f32 1e-05, %v400_v54  ;;  %v385_v3 = vadd.f32 %v349_v55, %v285_v62 }
 0x175   :  { %v461_v60 = vmul.f32 %v1140_v25, %v1453_v23  ;;  %v445_v45 = vmul.f32 %v1140_v25, %v1450_v22 }
 0x176   :  { %1145 = vrsqrt.f32 %v416_v61  ;;  %v401_v4 = vmul.f32 0.0078125, %v385_v3 }
 0x177   :  { %v352_v27 = vpop.xlane.xlu1 %351  ;;  %1021 = vmatmul.mubr.msk.f32.vlgmr.msra.gmra.mrb[0].mxu1 %vm91_vm0, %v461_v60  ;;  %1061 = vmatmul.mubr.msk.f32.vlgmr.msra.gmra.mrb[0].mxu0 %vm91_vm0, %v445_v45  ;;  %v288_v26 = vpop.xlane.xlu0 %287 }
 0x178   :  { %v1142_v44 = vpop.eup %1141  ;;  %v417_v7 = vadd.f32 1e-05, %v401_v4  ;;  %v386_v10 = vadd.f32 %v352_v27, %v288_v26 }
 0x179   :  { %v462_v14 = vmul.f32 %v1142_v44, %v1475_v46  ;;  %v446_v37 = vmul.f32 %v1142_v44, %v1472_v43 }
 0x17a   :  { %1147 = vrsqrt.f32 %v417_v7  ;;  %v402_v36 = vmul.f32 0.0078125, %v386_v10 }
 0x17b   :  { %v355_v23 = vpop.xlane.xlu1 %354  ;;  %1023 = vmatprep.mubr.msk.f32.mxu1 %vm91_vm0, %v462_v14  ;;  %1063 = vmatprep.mubr.msk.f32.mxu0 %vm91_vm0, %v446_v37  ;;  %v291_v22 = vpop.xlane.xlu0 %290 }
 0x17c   :  { %v1144_v15 = vpop.eup %1143  ;;  %v418_v18 = vadd.f32 1e-05, %v402_v36  ;;  %v387_v49 = vadd.f32 %v355_v23, %v291_v22 }
 0x17d   :  { %v463_v30 = vmul.f32 %v1144_v15, %v1486_v9  ;;  %v447_v31 = vmul.f32 %v1144_v15, %v1483_v59 }
 0x17e   :  { %1149 = vrsqrt.f32 %v418_v18  ;;  %v403_v38 = vmul.f32 0.0078125, %v387_v49 }
 0x17f   :  { %v358_v46 = vpop.xlane.xlu1 %357  ;;  %1024 = vmatmul.mubr.msk.f32.gmra.mrb[2].mxu1 %vm91_vm0, %v463_v30  ;;  %1064 = vmatmul.mubr.msk.f32.gmra.mrb[2].mxu0 %vm91_vm0, %v447_v31  ;;  %v294_v43 = vpop.xlane.xlu0 %293 }
 0x180   :  { %v1146_v0 = vpop.eup %1145  ;;  %v419_v2 = vadd.f32 1e-05, %v403_v38  ;;  %v388_v39 = vadd.f32 %v358_v46, %v294_v43 }
 0x181   :  { %v464_v1 = vmul.f32 %v1146_v0, %v1499_v11  ;;  %v448_v53 = vmul.f32 %v1146_v0, %v1496_v12 }
 0x182   :  { %1151 = vrsqrt.f32 %v419_v2  ;;  %v404_v5 = vmul.f32 0.0078125, %v388_v39 }
 0x183   :  { %v361_v9 = vpop.xlane.xlu1 %360  ;;  %1026 = vmatprep.mubr.msk.f32.mxu1 %vm91_vm0, %v464_v1  ;;  %1066 = vmatprep.mubr.msk.f32.mxu0 %vm91_vm0, %v448_v53  ;;  %v297_v59 = vpop.xlane.xlu0 %296 }
 0x184   :  { %v1148_v41 = vpop.eup %1147  ;;  %v420_v40 = vadd.f32 1e-05, %v404_v5  ;;  %v389_v21 = vadd.f32 %v361_v9, %v297_v59 }
 0x185   :  { %v465_v50 = vmul.f32 %v1148_v41, %v1511_v16  ;;  %v449_v33 = vmul.f32 %v1148_v41, %v1508_v35 }
 0x186   :  { %1153 = vrsqrt.f32 %v420_v40  ;;  %v405_v54 = vmul.f32 0.0078125, %v389_v21 }
 0x187   :  { %v364_v11 = vpop.xlane.xlu1 %363  ;;  %1027 = vmatmul.mubr.msk.f32.gmra.mrb[4].mxu1 %vm91_vm0, %v465_v50  ;;  %1067 = vmatmul.mubr.msk.f32.gmra.mrb[4].mxu0 %vm91_vm0, %v449_v33  ;;  %v300_v12 = vpop.xlane.xlu0 %299 }
 0x188   :  { %v1150_v55 = vpop.eup %1149  ;;  %v421_v62 = vadd.f32 1e-05, %v405_v54  ;;  %v390_v25 = vadd.f32 %v364_v11, %v300_v12 }
 0x189   :  { %v466_v61 = vmul.f32 %v1150_v55, %v1523_v20  ;;  %v450_v3 = vmul.f32 %v1150_v55, %v1520_v47 }
 0x18a   :  { %1155 = vrsqrt.f32 %v421_v62  ;;  %v406_v60 = vmul.f32 0.0078125, %v390_v25 }
 0x18b   :  { %v367_v16 = vpop.xlane.xlu1 %366  ;;  %1029 = vmatprep.mubr.msk.f32.mxu1 %vm91_vm0, %v466_v61  ;;  %1069 = vmatprep.mubr.msk.f32.mxu0 %vm91_vm0, %v450_v3  ;;  %v303_v35 = vpop.xlane.xlu0 %302 }
 0x18c   :  { %v1152_v45 = vpop.eup %1151  ;;  %v422_v4 = vadd.f32 1e-05, %v406_v60  ;;  %v391_v27 = vadd.f32 %v367_v16, %v303_v35 }
 0x18d   :  { %v467_v26 = vmul.f32 %v1152_v45, %v1535_v24  ;;  %v451_v44 = vmul.f32 %v1152_v45, %v1532_v63 }
 0x18e   :  { %1157 = vrsqrt.f32 %v422_v4  ;;  %v407_v7 = vmul.f32 0.0078125, %v391_v27 }
 0x18f   :  { %v370_v20 = vpop.xlane.xlu1 %369  ;;  %1030 = vmatmul.mubr.msk.f32.gmra.mrb[6].mxu1 %vm91_vm0, %v467_v26  ;;  %1070 = vmatmul.mubr.msk.f32.gmra.mrb[6].mxu0 %vm91_vm0, %v451_v44  ;;  %v306_v47 = vpop.xlane.xlu0 %305 }
 0x190   :  { %v1154_v10 = vpop.eup %1153  ;;  %v423_v14 = vadd.f32 1e-05, %v407_v7  ;;  %v392_v37 = vadd.f32 %v370_v20, %v306_v47 }
 0x191   :  { %v468_v36 = vmul.f32 %v1154_v10, %v1547_v17  ;;  %v452_v23 = vmul.f32 %v1154_v10, %v1544_v34 }
 0x192   :  { %1159 = vrsqrt.f32 %v423_v14  ;;  %v408_v22 = vmul.f32 0.0078125, %v392_v37 }
 0x193   :  { %v373_v24 = vpop.xlane.xlu1 %372  ;;  %1032 = vmatprep.mubr.msk.f32.mxu1 %vm91_vm0, %v468_v36  ;;  %1072 = vmatprep.mubr.msk.f32.mxu0 %vm91_vm0, %v452_v23  ;;  %v309_v63 = vpop.xlane.xlu0 %308 }
 0x194   :  { %v1156_v15 = vpop.eup %1155  ;;  %v424_v18 = vadd.f32 1e-05, %v408_v22  ;;  %v393_v49 = vadd.f32 %v373_v24, %v309_v63 }
 0x195   :  { %v469_v30 = vmul.f32 %v1156_v15, %v1559_v8  ;;  %v453_v31 = vmul.f32 %v1156_v15, %v1556_v58 }
 0x196   :  { %1161 = vrsqrt.f32 %v424_v18  ;;  %v409_v38 = vmul.f32 0.0078125, %v393_v49 }
 0x197   :  { %v376_v17 = vpop.xlane.xlu1 %375  ;;  %1033 = vmatmul.mubr.msk.f32.gmra.mrb[8].mxu1 %vm91_vm0, %v469_v30  ;;  %1073 = vmatmul.mubr.msk.f32.gmra.mrb[8].mxu0 %vm91_vm0, %v453_v31  ;;  %v312_v34 = vpop.xlane.xlu0 %311 }
 0x198   :  { %v1158_v46 = vpop.eup %1157  ;;  %v425_v43 = vadd.f32 1e-05, %v409_v38  ;;  %v394_v0 = vadd.f32 %v376_v17, %v312_v34 }
 0x199   :  { %v470_v2 = vmul.f32 %v1158_v46, %v1571_v19  ;;  %v454_v39 = vmul.f32 %v1158_v46, %v1568_v28 }
 0x19a   :  { %1163 = vrsqrt.f32 %v425_v43  ;;  %v410_v1 = vmul.f32 0.0078125, %v394_v0 }
 0x19b   :  { %v379_v8 = vpop.xlane.xlu1 %378  ;;  %1035 = vmatprep.mubr.msk.f32.mxu1 %vm91_vm0, %v470_v2  ;;  %1075 = vmatprep.mubr.msk.f32.mxu0 %vm91_vm0, %v454_v39  ;;  %v315_v58 = vpop.xlane.xlu0 %314 }
 0x19c   :  { %v1160_v53 = vpop.eup %1159  ;;  %v426_v5 = vadd.f32 1e-05, %v410_v1  ;;  %v395_v9 = vadd.f32 %v379_v8, %v315_v58 }
 0x19d   :  { %v471_v59 = vmul.f32 %v1160_v53, %v1583_v51  ;;  %v455_v41 = vmul.f32 %v1160_v53, %v1580_v32 }
 0x19e   :  { %1165 = vrsqrt.f32 %v426_v5  ;;  %v411_v40 = vmul.f32 0.0078125, %v395_v9 }
 0x19f   :  { %1036 = vmatmul.mubr.msk.f32.gmra.mrb[10].mxu1 %vm91_vm0, %v471_v59  ;;  %1076 = vmatmul.mubr.msk.f32.gmra.mrb[10].mxu0 %vm91_vm0, %v455_v41 }
 0x1a0   :  { %v1162_v28 = vpop.eup %1161  ;;  %v427_v19 = vadd.f32 1e-05, %v411_v40 }
 0x1a1   :  { %v472_v21 = vmul.f32 %v1162_v28, %v1595_v13  ;;  %v456_v50 = vmul.f32 %v1162_v28, %v1592_v6 }
 0x1a2   :  { %1167 = vrsqrt.f32 %v427_v19 }
 0x1a3   :  { %1038 = vmatprep.mubr.msk.f32.mxu1 %vm91_vm0, %v472_v21  ;;  %1078 = vmatprep.mubr.msk.f32.mxu0 %vm91_vm0, %v456_v50 }
 0x1a4   :  { %v1164_v51 = vpop.eup %1163 }
 0x1a5   :  { %v473_v32 = vmul.f32 %v1164_v51, %v1607_v48  ;;  %v457_v33 = vmul.f32 %v1164_v51, %v1604_v29 }
 0x1a7   :  { %1039 = vmatmul.mubr.msk.f32.gmra.mrb[12].mxu1 %vm91_vm0, %v473_v32  ;;  %1079 = vmatmul.mubr.msk.f32.gmra.mrb[12].mxu0 %vm91_vm0, %v457_v33 }
 0x1a8   :  { %v1166_v54 = vpop.eup %1165 }
 0x1a9   :  { %v474_v11 = vmul.f32 %v1166_v54, %v1619_v52  ;;  %v458_v13 = vmul.f32 %v1166_v54, %v1616_v42  ;;  %v1708_v52 = vld [vmem:[%s1793_s3] ss:$0 sm:$0xff] }
 0x1ab   :  { %1041 = vmatprep.mubr.msk.f32.mxu1 %vm91_vm0, %v474_v11  ;;  %1081 = vmatprep.mubr.msk.f32.mxu0 %vm91_vm0, %v458_v13 }
 0x1ac   :  { %v1168_v6 = vpop.eup %1167 }
 0x1ad   :  { %v475_v12 = vmul.f32 %v1168_v6, %v1631_v56  ;;  %v459_v48 = vmul.f32 %v1168_v6, %v1628_v57 }
 0x1af   :  { %1042 = vmatmul.mubr.msk.f32.gmra.mrb[14].mxu1 %vm91_vm0, %v475_v12  ;;  %1082 = vmatmul.mubr.msk.f32.gmra.mrb[14].mxu0 %vm91_vm0, %v459_v48 }
 0x24a   :  { %v1022_v29 = vpop.f32.mrb[0].mxu1  ;;  %v1062_v55 = vpop.f32.mrb[0].mxu0 }
 0x24b   :  { %v805_v42 = vadd.f32 %v1062_v55, %v1022_v29  ;;  %v606_v62 = vpop.f32.mrb[1].mxu1  ;;  %v799_v25 = vpop.f32.mrb[1].mxu0 }
 0x24c   :  { %v800_v61 = vadd.f32 %v799_v25, %v606_v62 }
 0x24d   :  { %v886_v3 = vadd.f32 %v1708_v52, %v805_v42 }
 0x24e   :  { %v885_v56 = vadd.f32 %v1708_v52, %v800_v61 }
 0x24f   :  { %902 = vst.msk [vmem:[%s1794_s4 + $0x8] sm:$0xff] %vm91_vm0, %v886_v3 }
 0x250   :  { %901 = vst.msk [vmem:[%s1794_s4] sm:$0xff] %vm91_vm0, %v885_v56 }
 0x252   :  { %v1025_v57 = vpop.f32.mrb[2].mxu1  ;;  %v1065_v60 = vpop.f32.mrb[2].mxu0 }
 0x253   :  { %v815_v16 = vadd.f32 %v1065_v60, %v1025_v57  ;;  %v616_v35 = vpop.f32.mrb[3].mxu1  ;;  %v809_v45 = vpop.f32.mrb[3].mxu0 }
 0x254   :  { %v810_v4 = vadd.f32 %v809_v45, %v616_v35 }
 0x255   :  { %v888_v27 = vadd.f32 %v1708_v52, %v815_v16 }
 0x256   :  { %v887_v26 = vadd.f32 %v1708_v52, %v810_v4 }
 0x257   :  { %904 = vst.msk [vmem:[%s1794_s4 + $0x18] sm:$0xff] %vm91_vm0, %v888_v27 }
 0x258   :  { %903 = vst.msk [vmem:[%s1794_s4 + $0x10] sm:$0xff] %vm91_vm0, %v887_v26 }
 0x25a   :  { %v1028_v44 = vpop.f32.mrb[4].mxu1  ;;  %v1068_v7 = vpop.f32.mrb[4].mxu0 }
 0x25b   :  { %v825_v20 = vadd.f32 %v1068_v7, %v1028_v44  ;;  %v626_v47 = vpop.f32.mrb[5].mxu1  ;;  %v819_v10 = vpop.f32.mrb[5].mxu0 }
 0x25c   :  { %v820_v14 = vadd.f32 %v819_v10, %v626_v47 }
 0x25d   :  { %v890_v37 = vadd.f32 %v1708_v52, %v825_v20 }
 0x25e   :  { %v889_v36 = vadd.f32 %v1708_v52, %v820_v14 }
 0x25f   :  { %906 = vst.msk [vmem:[%s1794_s4 + $0x28] sm:$0xff] %vm91_vm0, %v890_v37 }
 0x260   :  { %905 = vst.msk [vmem:[%s1794_s4 + $0x20] sm:$0xff] %vm91_vm0, %v889_v36 }
 0x262   :  { %v1031_v23 = vpop.f32.mrb[6].mxu1  ;;  %v1071_v22 = vpop.f32.mrb[6].mxu0 }
 0x263   :  { %v835_v24 = vadd.f32 %v1071_v22, %v1031_v23  ;;  %v636_v63 = vpop.f32.mrb[7].mxu1  ;;  %v829_v15 = vpop.f32.mrb[7].mxu0 }
 0x264   :  { %v830_v18 = vadd.f32 %v829_v15, %v636_v63 }
 0x265   :  { %v892_v49 = vadd.f32 %v1708_v52, %v835_v24 }
 0x266   :  { %v891_v30 = vadd.f32 %v1708_v52, %v830_v18 }
 0x267   :  { %908 = vst.msk [vmem:[%s1794_s4 + $0x38] sm:$0xff] %vm91_vm0, %v892_v49 }
 0x268   :  { %907 = vst.msk [vmem:[%s1794_s4 + $0x30] sm:$0xff] %vm91_vm0, %v891_v30 }
 0x26a   :  { %v1034_v31 = vpop.f32.mrb[8].mxu1  ;;  %v1074_v38 = vpop.f32.mrb[8].mxu0 }
 0x26b   :  { %v845_v17 = vadd.f32 %v1074_v38, %v1034_v31  ;;  %v646_v34 = vpop.f32.mrb[9].mxu1  ;;  %v839_v46 = vpop.f32.mrb[9].mxu0 }
 0x26c   :  { %v840_v43 = vadd.f32 %v839_v46, %v646_v34 }
 0x26d   :  { %v894_v0 = vadd.f32 %v1708_v52, %v845_v17 }
 0x26e   :  { %v893_v2 = vadd.f32 %v1708_v52, %v840_v43 }
 0x26f   :  { %910 = vst.msk [vmem:[%s1794_s4 + $0x48] sm:$0xff] %vm91_vm0, %v894_v0 }
 0x270   :  { %909 = vst.msk [vmem:[%s1794_s4 + $0x40] sm:$0xff] %vm91_vm0, %v893_v2 }
 0x272   :  { %v1037_v39 = vpop.f32.mrb[10].mxu1  ;;  %v1077_v1 = vpop.f32.mrb[10].mxu0 }
 0x273   :  { %v855_v8 = vadd.f32 %v1077_v1, %v1037_v39  ;;  %v656_v58 = vpop.f32.mrb[11].mxu1  ;;  %v849_v53 = vpop.f32.mrb[11].mxu0 }
 0x274   :  { %v850_v5 = vadd.f32 %v849_v53, %v656_v58 }
 0x275   :  { %v896_v9 = vadd.f32 %v1708_v52, %v855_v8 }
 0x276   :  { %v895_v59 = vadd.f32 %v1708_v52, %v850_v5 }
 0x277   :  { %912 = vst.msk [vmem:[%s1794_s4 + $0x58] sm:$0xff] %vm91_vm0, %v896_v9 }
 0x278   :  { %911 = vst.msk [vmem:[%s1794_s4 + $0x50] sm:$0xff] %vm91_vm0, %v895_v59 }
 0x27a   :  { %v1040_v41 = vpop.f32.mrb[12].mxu1  ;;  %v1080_v40 = vpop.f32.mrb[12].mxu0 }
 0x27b   :  { %v865_v28 = vadd.f32 %v1080_v40, %v1040_v41  ;;  %v666_v19 = vpop.f32.mrb[13].mxu1  ;;  %v859_v21 = vpop.f32.mrb[13].mxu0 }
 0x27c   :  { %v860_v50 = vadd.f32 %v859_v21, %v666_v19 }
 0x27d   :  { %v898_v51 = vadd.f32 %v1708_v52, %v865_v28 }
 0x27e   :  { %v897_v32 = vadd.f32 %v1708_v52, %v860_v50 }
 0x27f   :  { %914 = vst.msk [vmem:[%s1794_s4 + $0x68] sm:$0xff] %vm91_vm0, %v898_v51 }
 0x280   :  { %913 = vst.msk [vmem:[%s1794_s4 + $0x60] sm:$0xff] %vm91_vm0, %v897_v32 }
 0x282   :  { %v1043_v33 = vpop.f32.mrb[14].mxu1  ;;  %v1083_v54 = vpop.f32.mrb[14].mxu0 }
 0x283   :  { %v875_v11 = vadd.f32 %v1083_v54, %v1043_v33  ;;  %v676_v13 = vpop.f32.mrb[15].mxu1  ;;  %v869_v6 = vpop.f32.mrb[15].mxu0 }
 0x284   :  { %v870_v12 = vadd.f32 %v869_v6, %v676_v13 }
 0x285   :  { %v900_v48 = vadd.f32 %v1708_v52, %v875_v11 }
 0x286   :  { %v899_v29 = vadd.f32 %v1708_v52, %v870_v12 }
 0x287   :  { %916 = vst.msk [vmem:[%s1794_s4 + $0x78] sm:$0xff] %vm91_vm0, %v900_v48 }
 0x288   :  { %915 = vst.msk [vmem:[%s1794_s4 + $0x70] sm:$0xff] %vm91_vm0, %v899_v29 }
 0x289   :  { %921 = vsyncpa [#allocation3], 1 }
 0x28a   :  { %922 = vsyncpa [#allocation5], 1 }

</bundles_post_ra>
